<compile_context>
chip_gen: v5e
topology: v5e:2x2
jax: 0.10.0
libtpu: 0.0.40
codegen_flags: <defaults>
</compile_context>

<pallas_src>
import math

import jax
import jax.numpy as jnp
from jax.experimental import pallas as pl
from jax.experimental.pallas import tpu as pltpu


def _round_up(a: int, b: int) -> int:
    return (a + b - 1) // b * b


def _mean_lastdim_kernel(x_ref, o_ref):
    # x_ref: (TS, D) rows in VMEM; o_ref: (1, 1, TS) lane-dense output tile.
    x = x_ref[...].astype(jnp.float32)            # f32 accumulate (VPU/XLU have slack)
    inv_d = 1.0 / x.shape[-1]                     # static, true D (block D == full D)
    m = jnp.sum(x, axis=-1) * inv_d               # (TS,) XLU cross-lane reduce
    o_ref[...] = m.astype(o_ref.dtype)[None, None, :]   # unmasked lane-dense store


def critic_net_forward(x):
    """torch: x.mean(-1, keepdim=True) -> shape x.shape[:-1] + (1,)."""
    orig_shape = x.shape
    D = orig_shape[-1]
    lead = orig_shape[:-1]
    N = math.prod(lead) if lead else 1
    itemsize = jnp.dtype(x.dtype).itemsize

    x2 = x.reshape(N, D)

    # --- row-tile sizing ----------------------------------------------------
    # Keep the double-buffered input tile under ~12 MiB (fits every
    # generation's default scoped-VMEM budget: v5e 16 MiB, v6e/v7x 32 MiB),
    # while keeping tiles >=128 rows when the input allows, to amortize the
    # ~0.35 us/grid-step overhead and keep per-step DMAs large.
    sublane = max(8, 32 // itemsize)              # 8 (f32) / 16 (bf16) / 32 (int8)
    in_budget = 12 * 1024 * 1024                  # bytes for the 2 input buffers
    cap_rows = max(sublane, in_budget // (2 * D * itemsize))
    ts = min(1024, cap_rows, _round_up(N, 128))
    if ts >= 128:
        ts = (ts // 128) * 128                    # lane-dense output + sublane aligned
    else:
        ts = _round_up(ts, sublane)               # very-wide-D fallback, still legal
    # (For extremely wide D one could add a second "arbitrary" grid axis over D
    #  with a VMEM accumulator; unnecessary at these shapes.)

    n_pad = _round_up(N, ts)
    if n_pad != N:
        # Padded rows reduce to zeros and are sliced off below, so they never
        # touch real output.
        x2 = jnp.pad(x2, ((0, n_pad - N), (0, 0)))
    num_tiles = n_pad // ts

    out_tiles = pl.pallas_call(
        _mean_lastdim_kernel,
        out_shape=jax.ShapeDtypeStruct((num_tiles, 1, ts), x.dtype),
        grid_spec=pltpu.PrefetchScalarGridSpec(
            num_scalar_prefetch=0,
            grid=(num_tiles,),
            in_specs=[pl.BlockSpec((ts, D), lambda i: (i, 0))],
            out_specs=pl.BlockSpec((1, 1, ts), lambda i: (i, 0, 0)),
        ),
        compiler_params=pltpu.CompilerParams(
            dimension_semantics=("parallel",),    # megacore shard on v7x; no-op v5e/v6e
            vmem_limit_bytes=32 * 1024 * 1024,
        ),
        cost_estimate=pl.CostEstimate(
            flops=n_pad * D,
            transcendentals=0,
            bytes_accessed=n_pad * D * itemsize + n_pad * itemsize,
        ),
    )(x2)

    return out_tiles.reshape(n_pad)[:N].reshape(*lead, 1)


if __name__ == "__main__":
    key = jax.random.PRNGKey(0)
    k1, k2 = jax.random.split(key)

    # Small [B, S, D] input consistent with the module's usage.
    x1 = jax.random.normal(k1, (2, 8, 128), dtype=jnp.float32)
    out1 = critic_net_forward(x1)
    jax.block_until_ready(out1)
    ref1 = jnp.mean(x1, axis=-1, keepdims=True)
    assert out1.shape == ref1.shape, (out1.shape, ref1.shape)
    assert jnp.allclose(out1, ref1, atol=1e-5, rtol=1e-5), "mismatch vs reference (case 1)"

    # Second shape exercising multi-tile grid + row padding (+ non-128 D).
    x2 = jax.random.normal(k2, (4, 500, 64), dtype=jnp.float32)
    out2 = critic_net_forward(x2)
    jax.block_until_ready(out2)
    ref2 = jnp.mean(x2, axis=-1, keepdims=True)
    assert out2.shape == ref2.shape, (out2.shape, ref2.shape)
    assert jnp.allclose(out2, ref2, atol=1e-5, rtol=1e-5), "mismatch vs reference (case 2)"

    print("KERNEL_OK")
</pallas_src>

<mosaic_0001>
module attributes {stable_mosaic.version = 11 : i64} {
  func.func @_mean_lastdim_kernel(%arg0: i32, %arg1: memref<128x128xf32, #tpu.memory_space<vmem>>, %arg2: memref<1x1x128xf32, #tpu.memory_space<vmem>>) attributes {dimension_semantics = [#tpu.dimension_semantics<parallel>], iteration_bounds = array<i64: 1>, scalar_prefetch = 0 : i64, scratch_operands = 0 : i64, tpu.core_type = #tpu.core_type<tc>, window_params = [{transform_indices = @transform_0, window_bounds = array<i64: 128, 128>}, {transform_indices = @transform_1, window_bounds = array<i64: 1, 1, 128>}]} {
    %c0 = arith.constant 0 : index
    %c0_0 = arith.constant 0 : index
    %0 = vector.load %arg1[%c0, %c0_0] : memref<128x128xf32, #tpu.memory_space<vmem>>, vector<128x128xf32>
    %cst = arith.constant dense<0.000000e+00> : vector<128xf32>
    %1 = vector.multi_reduction <add>, %0, %cst [1] : vector<128x128xf32> to vector<128xf32>
    %cst_1 = arith.constant 7.812500e-03 : f32
    %2 = vector.broadcast %cst_1 : f32 to vector<128xf32>
    %3 = arith.mulf %1, %2 : vector<128xf32>
    %4 = vector.shape_cast %3 : vector<128xf32> to vector<1x1x128xf32>
    %c0_2 = arith.constant 0 : index
    %c0_3 = arith.constant 0 : index
    %c0_4 = arith.constant 0 : index
    %5 = vector.load %arg2[%c0_2, %c0_3, %c0_4] : memref<1x1x128xf32, #tpu.memory_space<vmem>>, vector<1x1x128xf32>
    tpu.vector_store %arg2[%c0_2, %c0_3, %c0_4], %4 {strides = array<i32>} : memref<1x1x128xf32, #tpu.memory_space<vmem>>, vector<1x1x128xf32>,
    return
  }
  func.func @transform_0(%arg0: i32) -> (i32, i32) {
    %c0_i32 = arith.constant 0 : i32
    %c0_i32_0 = arith.constant 0 : i32
    return %arg0, %c0_i32 : i32, i32
  }
  func.func @transform_1(%arg0: i32) -> (i32, i32, i32) {
    %c0_i32 = arith.constant 0 : i32
    %c0_i32_0 = arith.constant 0 : i32
    %c0_i32_1 = arith.constant 0 : i32
    return %arg0, %c0_i32, %c0_i32_0 : i32, i32, i32
  }
}

</mosaic_0001>

<bundles_post_ra>
// kernel: tpu_custom_call.1
= control target key start
LH: loop header
LB: loop body
LE: loop exit
PB: predicated region body
PF: predicated region fallthrough
CT: control target
= control target key end

     0   :  { %6 = vsyncpa [#allocation3], 0  ;;  %s281_s0 = inlined_call_operand.hbm [shape: f32[128,128], index: 0, kind: input, shape index: {}]   ;;  %s282_s1 = inlined_call_operand.hbm [shape: f32[1,1,128], index: 1, kind: output, shape index: {}]  }
   0x1   :  { %7 = vsyncpa [#allocation4], 0  ;;  %s12_s8 = sshll.u32 %s281_s0, 4  ;;  %s243_s9 = smov [#allocation2]   ;;  %s13_s8 = int_to_ptr.hbm [resolvable:$true] %s12_s8 }
   0x2   :  { %s14_s10 = sshll.u32 %s243_s9, 4  ;;  %s244_s11 = smov 128   ;;  %s15_s10 = int_to_ptr.vmem [resolvable:$true] %s14_s10 }
   0x3   :  { %s245_s12 = smov 8  }
   0x4   :  { %20 = dma.hbm_to_vmem [thread:$0]  %s13_s8, 2048, %s15_s10, [#allocation3], %s244_s11, %s244_s11, %s245_s12  }
   0x5   :  { %239 = dma.done.wait [#allocation3], 2048  }
   0x6   :  { %240 = vsyncadd [#allocation3], 4294965248  ;;  %v25_v0 = vld [vmem:[#allocation2] sm:$0xff]  ;;  %v27_v1 = vld [vmem:[#allocation2 + $0x10] sm:$0xff]  ;;  %v105_v18 = vlaneseq  ;;  %vm110_vm0 = vcmask 130112   ;;  %vm114_vm1 = vcmask 195712  }
   0x7   :  { %v29_v2 = vld [vmem:[#allocation2 + $0x20] sm:$0xff]  ;;  %41 = vadd.xlane.f32.xlu0 %v25_v0  ;;  %45 = vadd.xlane.f32.xlu1 %v27_v1  ;;  %v26_v3 = vld [vmem:[#allocation2 + $0x8] sm:$0xff]  ;;  %v28_v4 = vld [vmem:[#allocation2 + $0x18] sm:$0xff]  ;;  %vm118_vm2 = vcmask 261312   ;;  %vm122_vm3 = vcmask 326912   ;;  %vm126_vm4 = vcmask 392512  }
   0x8   :  { %49 = vadd.xlane.f32.xlu2 %v29_v2  ;;  %v30_v5 = vld [vmem:[#allocation2 + $0x28] sm:$0xff]  ;;  %v31_v6 = vld [vmem:[#allocation2 + $0x30] sm:$0xff]  ;;  %v32_v7 = vld [vmem:[#allocation2 + $0x38] sm:$0xff]  ;;  %v260_v20 = vand.u32 127, %v105_v18  ;;  %vm130_vm5 = vcmask 458112   ;;  %vm134_vm6 = vcmask 523712  }
   0x9   :  { %v33_v8 = vld [vmem:[#allocation2 + $0x40] sm:$0xff]  ;;  %v34_v9 = vld [vmem:[#allocation2 + $0x48] sm:$0xff]  ;;  %v35_v10 = vld [vmem:[#allocation2 + $0x50] sm:$0xff]  ;;  %vm138_vm7 = vcmask 589312   ;;  %vm142_vm8 = vcmask 654912   ;;  %vm146_vm9 = vcmask 720512  }
   0xa   :  { %v36_v11 = vld [vmem:[#allocation2 + $0x58] sm:$0xff]  ;;  %v37_v12 = vld [vmem:[#allocation2 + $0x60] sm:$0xff]  ;;  %v38_v13 = vld [vmem:[#allocation2 + $0x68] sm:$0xff]  ;;  %v108_v22 = vadd.s32 4294967288, %v260_v20  ;;  %v112_v23 = vadd.s32 4294967280, %v260_v20  ;;  %v116_v28 = vadd.s32 4294967272, %v260_v20 }
   0xb   :  { %v39_v14 = vld [vmem:[#allocation2 + $0x70] sm:$0xff]  ;;  %v40_v15 = vld [vmem:[#allocation2 + $0x78] sm:$0xff]  ;;  %v120_v36 = vadd.s32 4294967264, %v260_v20  ;;  %v124_v39 = vadd.s32 4294967256, %v260_v20  ;;  %v128_v41 = vadd.s32 4294967248, %v260_v20  ;;  %v132_v49 = vadd.s32 4294967240, %v260_v20 }
   0xc   :  { %v136_v53 = vadd.s32 4294967232, %v260_v20  ;;  %v140_v57 = vadd.s32 4294967224, %v260_v20  ;;  %v144_v0 = vadd.s32 4294967216, %v260_v20  ;;  %vm150_vm10 = vcmask 786112   ;;  %s246_s0 = smov [#allocation5]   ;;  %s177_s16 = sshll.u32 %s282_s1, 4  ;;  %s178_s16 = int_to_ptr.hbm [resolvable:$true] %s177_s16 }
   0xd   :  { %vm154_vm11 = vcmask 851712   ;;  %vm158_vm12 = vcmask 917312   ;;  %vm162_vm13 = vcmask 982912   ;;  %s175_s13 = sshll.u32 %s246_s0, 4  ;;  %vm166_vm14 = vcmask 1048512   ;;  %s176_s13 = int_to_ptr.vmem [resolvable:$true] %s175_s13 }
   0xf   :  { %43 = vadd.xlane.f32.xlu0 %v26_v3  ;;  %47 = vadd.xlane.f32.xlu1 %v28_v4  ;;  %v148_v4 = vadd.s32 4294967208, %v260_v20 }
  0x10   :  { %51 = vadd.xlane.f32.xlu2 %v30_v5 }
  0x17   :  { %53 = vadd.xlane.f32.xlu0 %v31_v6  ;;  %55 = vadd.xlane.f32.xlu1 %v32_v7 }
  0x18   :  { %57 = vadd.xlane.f32.xlu2 %v33_v8 }
  0x1f   :  { %59 = vadd.xlane.f32.xlu0 %v34_v9  ;;  %61 = vadd.xlane.f32.xlu1 %v35_v10  ;;  %v152_v9 = vadd.s32 4294967200, %v260_v20 }
  0x20   :  { %63 = vadd.xlane.f32.xlu2 %v36_v11 }
  0x27   :  { %65 = vadd.xlane.f32.xlu0 %v37_v12  ;;  %67 = vadd.xlane.f32.xlu1 %v38_v13 }
  0x28   :  { %69 = vadd.xlane.f32.xlu2 %v39_v14  ;;  %v156_v14 = vadd.s32 4294967192, %v260_v20 }
  0x2f   :  { %71 = vadd.xlane.f32.xlu0 %v40_v15 }
  0x7a   :  { %v42_v16 = vpop.xlane.xlu0 %41  ;;  %v46_v17 = vpop.xlane.xlu1 %45 }
  0x7b   :  { %v50_v19 = vpop.xlane.xlu2 %49  ;;  %v73_v21 = vmul.f32 0.0078125, %v42_v16  ;;  %v75_v24 = vmul.f32 0.0078125, %v46_v17 }
  0x7c   :  { %v77_v37 = vmul.f32 0.0078125, %v50_v19  ;;  %v160_v19 = vadd.s32 4294967184, %v260_v20 }
  0x7d   :  { %v107_v31 = vperm.slane %v73_v21, %v260_v20  ;;  %v113_v33 = vperm.slane %v75_v24, %v112_v23 }
  0x7e   :  { %v121_v47 = vperm.slane %v77_v37, %v120_v36 }
  0x82   :  { %v44_v25 = vpop.xlane.xlu0 %43  ;;  %v48_v26 = vpop.xlane.xlu1 %47 }
  0x83   :  { %v74_v27 = vmul.f32 0.0078125, %v44_v25  ;;  %v76_v29 = vmul.f32 0.0078125, %v48_v26  ;;  %v52_v30 = vpop.xlane.xlu2 %51  ;;  %v164_v25 = vadd.s32 4294967176, %v260_v20 }
  0x84   :  { %v78_v40 = vmul.f32 0.0078125, %v52_v30 }
  0x85   :  { %v109_v32 = vperm.slane %v74_v27, %v108_v22  ;;  %v117_v35 = vperm.slane %v76_v29, %v116_v28 }
  0x86   :  { %v125_v48 = vperm.slane %v78_v40, %v124_v39 }
  0x87   :  { %v111_v34 = vsel %vm110_vm0, %v109_v32, %v107_v31 }
  0x88   :  { %v115_v38 = vsel %vm114_vm1, %v113_v33, %v111_v34 }
  0x89   :  { %v119_v44 = vsel %vm118_vm2, %v117_v35, %v115_v38 }
  0x8a   :  { %v54_v42 = vpop.xlane.xlu0 %53  ;;  %v56_v43 = vpop.xlane.xlu1 %55  ;;  %v123_v51 = vsel %vm122_vm3, %v121_v47, %v119_v44 }
  0x8b   :  { %v79_v45 = vmul.f32 0.0078125, %v54_v42  ;;  %v58_v46 = vpop.xlane.xlu2 %57  ;;  %v80_v50 = vmul.f32 0.0078125, %v56_v43  ;;  %v127_v55 = vsel %vm126_vm4, %v125_v48, %v123_v51 }
  0x8c   :  { %v81_v54 = vmul.f32 0.0078125, %v58_v46 }
  0x8d   :  { %v129_v52 = vperm.slane %v79_v45, %v128_v41  ;;  %v133_v56 = vperm.slane %v80_v50, %v132_v49 }
  0x8e   :  { %v137_v63 = vperm.slane %v81_v54, %v136_v53 }
  0x8f   :  { %v131_v58 = vsel %vm130_vm5, %v129_v52, %v127_v55 }
  0x90   :  { %v135_v2 = vsel %vm134_vm6, %v133_v56, %v131_v58 }
  0x91   :  { %v139_v6 = vsel %vm138_vm7, %v137_v63, %v135_v2 }
  0x92   :  { %v60_v59 = vpop.xlane.xlu0 %59  ;;  %v62_v60 = vpop.xlane.xlu1 %61 }
  0x93   :  { %v82_v61 = vmul.f32 0.0078125, %v60_v59  ;;  %v64_v62 = vpop.xlane.xlu2 %63  ;;  %v83_v1 = vmul.f32 0.0078125, %v62_v60 }
  0x94   :  { %v84_v5 = vmul.f32 0.0078125, %v64_v62 }
  0x95   :  { %v141_v3 = vperm.slane %v82_v61, %v140_v57  ;;  %v145_v7 = vperm.slane %v83_v1, %v144_v0 }
  0x96   :  { %v149_v12 = vperm.slane %v84_v5, %v148_v4 }
  0x97   :  { %v143_v8 = vsel %vm142_vm8, %v141_v3, %v139_v6 }
  0x98   :  { %v147_v17 = vsel %vm146_vm9, %v145_v7, %v143_v8 }
  0x99   :  { %v151_v22 = vsel %vm150_vm10, %v149_v12, %v147_v17 }
  0x9a   :  { %v66_v10 = vpop.xlane.xlu0 %65  ;;  %v68_v11 = vpop.xlane.xlu1 %67 }
  0x9b   :  { %v85_v13 = vmul.f32 0.0078125, %v66_v10  ;;  %v86_v15 = vmul.f32 0.0078125, %v68_v11  ;;  %v70_v16 = vpop.xlane.xlu2 %69 }
  0x9c   :  { %v87_v21 = vmul.f32 0.0078125, %v70_v16 }
  0x9d   :  { %v153_v18 = vperm.slane %v85_v13, %v152_v9  ;;  %v157_v23 = vperm.slane %v86_v15, %v156_v14 }
  0x9e   :  { %v161_v26 = vperm.slane %v87_v21, %v160_v19 }
  0x9f   :  { %v155_v24 = vsel %vm154_vm11, %v153_v18, %v151_v22 }
  0xa0   :  { %v159_v28 = vsel %vm158_vm12, %v157_v23, %v155_v24 }
  0xa1   :  { %v163_v31 = vsel %vm162_vm13, %v161_v26, %v159_v28 }
  0xa2   :  { %v72_v27 = vpop.xlane.xlu0 %71 }
  0xa3   :  { %v88_v29 = vmul.f32 0.0078125, %v72_v27 }
  0xa5   :  { %v165_v30 = vperm.slane %v88_v29, %v164_v25 }
  0xa7   :  { %v167_v32 = vsel %vm166_vm14, %v165_v30, %v163_v31 }
  0xa8   :  { %169 = vst [vmem:[#allocation5] sm:$0x1] %v167_v32 }
  0xa9   :  { %180 = dma.vmem_to_hbm [thread:$0]  %s176_s13, 16, %s178_s16, [#allocation4]  }
  0xaa   :  { %241 = dma.done.wait [#allocation4], 16  }
  0xab   :  { %242 = vsyncadd [#allocation4], 4294967280 }
  0xac   :  { %185 = vsyncpa [#allocation3], 1 }
  0xad   :  { %186 = vsyncpa [#allocation4], 1 }

</bundles_post_ra>
